<compile_context>
chip_gen: v7x
topology: tpu7x:2x2x1
jax: 0.10.0
libtpu: 0.0.40
codegen_flags: <defaults>
</compile_context>

<pallas_src>
import functools

import jax
import jax.numpy as jnp
from jax.experimental import pallas as pl
from jax.experimental.pallas import tpu as pltpu

LANES = 128              # lane width
MAX_BLOCK_ROWS = 4096    # 4096 x 128 f32 = 2 MiB per input block


def _dice_bce_kernel(x_ref, t_ref, out_ref, *, total_rows, block_rows):
    x = x_ref[...].astype(jnp.float32)
    t = t_ref[...].astype(jnp.float32)

    p = jax.nn.sigmoid(x)
    # PyTorch binary_cross_entropy semantics: log terms clamped at -100.
    log_p = jnp.maximum(jnp.log(p), -100.0)
    log_1mp = jnp.maximum(jnp.log(1.0 - p), -100.0)
    # -(t*log_p + (1-t)*log_1mp), written with one fewer multiply.
    bce = -(log_1mp + t * (log_p - log_1mp))

    def write(pt, pv, tv, bv):
        # Per-lane partial sums for the four reduction terms -> (1, 4, 128).
        partial = jnp.stack(
            [jnp.sum(v, axis=0) for v in (pt, pv, tv, bv)], axis=0)
        out_ref[...] = partial[None]

    if total_rows % block_rows == 0:
        # No ragged tail: pure VPU/EUP hot path, no masking anywhere.
        write(p * t, p, t, bce)
    else:
        i = pl.program_id(0)
        is_last = i == pl.num_programs(0) - 1

        @pl.when(jnp.logical_not(is_last))
        def _():
            write(p * t, p, t, bce)

        @pl.when(is_last)
        def _():
            # Only the final block pays for the mask; out-of-bounds rows of
            # the block contain unspecified data, so use a NaN-safe select.
            rid = jax.lax.broadcasted_iota(jnp.int32, (block_rows, LANES), 0)
            valid = (i * block_rows + rid) < total_rows
            write(jnp.where(valid, p * t, 0.0),
                  jnp.where(valid, p, 0.0),
                  jnp.where(valid, t, 0.0),
                  jnp.where(valid, bce, 0.0))


def dice_bce_loss(inputs, targets, smooth=1.0):
    """Equivalent of DiceBCELoss.forward(inputs, targets, smooth)."""
    assert inputs.shape == targets.shape
    n = int(inputs.size)

    # Keep native dtypes here (cast happens in-kernel) to minimize HBM reads.
    x = inputs.reshape(-1)
    t = targets.reshape(-1)

    # Only pad when the flat length is not a multiple of the lane width
    # (rare for image tensors).  Padding values are "safe": sigmoid(-1e4) == 0
    # and target 0, so padded elements contribute exactly 0 to every sum.
    if n % LANES != 0:
        pad = LANES - n % LANES
        x = jnp.concatenate([x, jnp.full((pad,), -1e4, dtype=x.dtype)])
        t = jnp.concatenate([t, jnp.zeros((pad,), dtype=t.dtype)])

    rows = x.shape[0] // LANES
    x2 = x.reshape(rows, LANES)
    t2 = t.reshape(rows, LANES)

    # Big lane-dense tiles; full-array block when the input is small.
    block_rows = rows if rows <= MAX_BLOCK_ROWS else MAX_BLOCK_ROWS
    n_blocks = pl.cdiv(rows, block_rows)

    kernel = functools.partial(
        _dice_bce_kernel, total_rows=rows, block_rows=block_rows)

    partials = pl.pallas_call(
        kernel,
        out_shape=jax.ShapeDtypeStruct((n_blocks, 4, LANES), jnp.float32),
        grid=(n_blocks,),
        in_specs=[
            pl.BlockSpec((block_rows, LANES), lambda i: (i, 0)),
            pl.BlockSpec((block_rows, LANES), lambda i: (i, 0)),
        ],
        out_specs=pl.BlockSpec((1, 4, LANES), lambda i: (i, 0, 0)),
        compiler_params=pltpu.CompilerParams(
            dimension_semantics=("parallel",)),
    )(x2, t2)

    # Tiny final combine in plain JAX (works for any number of blocks and
    # lets the grid axis stay fully parallel across TensorCores).
    sums = jnp.sum(partials, axis=(0, 2))               # (4,)
    intersection, p_sum, t_sum, bce_sum = sums[0], sums[1], sums[2], sums[3]
    bce_mean = bce_sum / jnp.float32(n)
    dice_loss = 1.0 - (2.0 * intersection + smooth) / (p_sum + t_sum + smooth)
    return bce_mean + dice_loss


def _reference(inputs, targets, smooth=1.0):
    p = jax.nn.sigmoid(inputs.astype(jnp.float32)).reshape(-1)
    t = targets.astype(jnp.float32).reshape(-1)
    intersection = jnp.sum(p * t)
    dice = 1.0 - (2.0 * intersection + smooth) / (jnp.sum(p) + jnp.sum(t) + smooth)
    bce = jnp.mean(-(t * jnp.maximum(jnp.log(p), -100.0)
                     + (1.0 - t) * jnp.maximum(jnp.log(1.0 - p), -100.0)))
    return bce + dice


if __name__ == "__main__":
    key = jax.random.PRNGKey(0)
    k1, k2, k3, k4, k5, k6 = jax.random.split(key, 6)

    # 1) Small NCHW logits and binary targets: B=2, C=4, H=W=16 (single block).
    logits = jax.random.normal(k1, (2, 4, 16, 16), dtype=jnp.float32) * 2.0
    targets = (jax.random.uniform(k2, (2, 4, 16, 16)) > 0.5).astype(jnp.float32)
    loss = jax.block_until_ready(dice_bce_loss(logits, targets))
    ref = jax.block_until_ready(_reference(logits, targets))
    assert jnp.allclose(loss, ref, rtol=1e-5, atol=1e-5), (loss, ref)

    # 2) Multi-block case exercising the masked partial last block:
    #    rows = 2*4*256*288/128 = 4608 -> one full 4096-row block + 512 tail.
    logits2 = jax.random.normal(k3, (2, 4, 256, 288), dtype=jnp.float32) * 2.0
    targets2 = (jax.random.uniform(k4, (2, 4, 256, 288)) > 0.5).astype(jnp.float32)
    loss2 = jax.block_until_ready(dice_bce_loss(logits2, targets2))
    ref2 = jax.block_until_ready(_reference(logits2, targets2))
    assert jnp.allclose(loss2, ref2, rtol=1e-4, atol=1e-4), (loss2, ref2)

    # 3) bf16 logits with a flat length that is not a multiple of 128
    #    (exercises the safe-padding path and the in-kernel cast).
    logits3 = (jax.random.normal(k5, (3, 5, 7, 9), dtype=jnp.float32) * 2.0
               ).astype(jnp.bfloat16)
    targets3 = (jax.random.uniform(k6, (3, 5, 7, 9)) > 0.5).astype(jnp.float32)
    loss3 = jax.block_until_ready(dice_bce_loss(logits3, targets3))
    ref3 = jax.block_until_ready(_reference(logits3, targets3))
    assert jnp.allclose(loss3, ref3, rtol=1e-4, atol=1e-4), (loss3, ref3)

    print("KERNEL_OK")
</pallas_src>

<mosaic_0001>
module attributes {stable_mosaic.version = 11 : i64} {
  func.func @_dice_bce_kernel(%arg0: i32, %arg1: memref<16x128xf32, #tpu.memory_space<vmem>>, %arg2: memref<16x128xf32, #tpu.memory_space<vmem>>, %arg3: memref<1x4x128xf32, #tpu.memory_space<vmem>>) attributes {dimension_semantics = [#tpu.dimension_semantics<parallel>], iteration_bounds = array<i64: 1>, scalar_prefetch = 0 : i64, scratch_operands = 0 : i64, tpu.core_type = #tpu.core_type<tc>, window_params = [{transform_indices = @transform_0, window_bounds = array<i64: 16, 128>}, {transform_indices = @transform_1, window_bounds = array<i64: 16, 128>}, {transform_indices = @transform_2, window_bounds = array<i64: 1, 4, 128>}]} {
    %c0 = arith.constant 0 : index
    %c0_0 = arith.constant 0 : index
    %0 = vector.load %arg1[%c0, %c0_0] : memref<16x128xf32, #tpu.memory_space<vmem>>, vector<16x128xf32>
    %c0_1 = arith.constant 0 : index
    %c0_2 = arith.constant 0 : index
    %1 = vector.load %arg2[%c0_1, %c0_2] : memref<16x128xf32, #tpu.memory_space<vmem>>, vector<16x128xf32>
    %2 = arith.negf %0 : vector<16x128xf32>
    %3 = math.exp %2 : vector<16x128xf32>
    %cst = arith.constant 1.000000e+00 : f32
    %4 = vector.broadcast %cst : f32 to vector<16x128xf32>
    %5 = arith.addf %4, %3 : vector<16x128xf32>
    %6 = arith.divf %4, %5 : vector<16x128xf32>
    %7 = math.log %6 : vector<16x128xf32>
    %cst_3 = arith.constant -1.000000e+02 : f32
    %8 = vector.broadcast %cst_3 : f32 to vector<16x128xf32>
    %9 = arith.maximumf %7, %8 : vector<16x128xf32>
    %cst_4 = arith.constant 1.000000e+00 : f32
    %10 = vector.broadcast %cst_4 : f32 to vector<16x128xf32>
    %11 = arith.subf %10, %6 : vector<16x128xf32>
    %12 = math.log %11 : vector<16x128xf32>
    %cst_5 = arith.constant -1.000000e+02 : f32
    %13 = vector.broadcast %cst_5 : f32 to vector<16x128xf32>
    %14 = arith.maximumf %12, %13 : vector<16x128xf32>
    %15 = arith.subf %9, %14 : vector<16x128xf32>
    %16 = arith.mulf %1, %15 : vector<16x128xf32>
    %17 = arith.addf %14, %16 : vector<16x128xf32>
    %cst_6 = arith.constant 0.000000e+00 : f32
    %18 = vector.broadcast %cst_6 : f32 to vector<16x128xf32>
    %19 = arith.subf %18, %17 : vector<16x128xf32>
    %20 = arith.mulf %6, %1 : vector<16x128xf32>
    %cst_7 = arith.constant dense<0.000000e+00> : vector<128xf32>
    %21 = vector.multi_reduction <add>, %20, %cst_7 [0] : vector<16x128xf32> to vector<128xf32>
    %cst_8 = arith.constant dense<0.000000e+00> : vector<128xf32>
    %22 = vector.multi_reduction <add>, %6, %cst_8 [0] : vector<16x128xf32> to vector<128xf32>
    %cst_9 = arith.constant dense<0.000000e+00> : vector<128xf32>
    %23 = vector.multi_reduction <add>, %1, %cst_9 [0] : vector<16x128xf32> to vector<128xf32>
    %cst_10 = arith.constant dense<0.000000e+00> : vector<128xf32>
    %24 = vector.multi_reduction <add>, %19, %cst_10 [0] : vector<16x128xf32> to vector<128xf32>
    %25 = vector.shape_cast %21 : vector<128xf32> to vector<1x128xf32>
    %26 = vector.shape_cast %22 : vector<128xf32> to vector<1x128xf32>
    %27 = vector.shape_cast %23 : vector<128xf32> to vector<1x128xf32>
    %28 = vector.shape_cast %24 : vector<128xf32> to vector<1x128xf32>
    %29 = tpu.concatenate %25, %26, %27, %28 in 0 : vector<1x128xf32>, vector<1x128xf32>, vector<1x128xf32>, vector<1x128xf32> -> vector<4x128xf32>
    %30 = vector.shape_cast %29 : vector<4x128xf32> to vector<1x4x128xf32>
    %c0_11 = arith.constant 0 : index
    %c0_12 = arith.constant 0 : index
    %c0_13 = arith.constant 0 : index
    %31 = vector.load %arg3[%c0_11, %c0_12, %c0_13] : memref<1x4x128xf32, #tpu.memory_space<vmem>>, vector<1x4x128xf32>
    tpu.vector_store %arg3[%c0_11, %c0_12, %c0_13], %30 {strides = array<i32>} : memref<1x4x128xf32, #tpu.memory_space<vmem>>, vector<1x4x128xf32>,
    return
  }
  func.func @transform_0(%arg0: i32) -> (i32, i32) {
    %c0_i32 = arith.constant 0 : i32
    %c0_i32_0 = arith.constant 0 : i32
    return %arg0, %c0_i32 : i32, i32
  }
  func.func @transform_1(%arg0: i32) -> (i32, i32) {
    %c0_i32 = arith.constant 0 : i32
    %c0_i32_0 = arith.constant 0 : i32
    return %arg0, %c0_i32 : i32, i32
  }
  func.func @transform_2(%arg0: i32) -> (i32, i32, i32) {
    %c0_i32 = arith.constant 0 : i32
    %c0_i32_0 = arith.constant 0 : i32
    %c0_i32_1 = arith.constant 0 : i32
    return %arg0, %c0_i32, %c0_i32_0 : i32, i32, i32
  }
}

</mosaic_0001>

<bundles_post_ra>
// kernel: tpu_custom_call.1
= control target key start
LH: loop header
LB: loop body
LE: loop exit
PB: predicated region body
PF: predicated region fallthrough
CT: control target
= control target key end

     0   :  { %7 = vsyncpa [#allocation3], 0  ;;  %s282_s0 = inlined_call_operand.hbm [shape: f32[16,128], index: 0, kind: input, shape index: {}]   ;;  %s283_s1 = inlined_call_operand.hbm [shape: f32[16,128], index: 1, kind: input, shape index: {}]   ;;  %s284_s2 = inlined_call_operand.hbm [shape: f32[1,4,128], index: 2, kind: output, shape index: {}]  }
   0x1   :  { %8 = vsyncpa [#allocation6], 0 }
   0x2   :  { %9 = vsyncpa [#allocation4], 0  ;;  %s226_s9 = smov [#allocation2]   ;;  %s154_s13 = scalar_lea.hbm %s282_s0, 256 }
   0x3   :  { %s15_s10 = sshll.u32 %s226_s9, 4  ;;  %p155_p0 = scmp.ne.s32.totalorder %s282_s0, %s154_s13  ;;  %s16_s10 = int_to_ptr.vmem [resolvable:$true] %s15_s10 }
   0x4   :  { %p158_p1 = scmp.lt.u32.totalorder %s154_s13, %s282_s0 }
   0x6   :  { %p160_p2 = pnand %p158_p1, %p155_p0 }
   0x8   :  { %163 = shalt.err (!%p160_p2)
}
   0x9   :  { %s164_s18 = scalar_lea.vmem %s16_s10, 256  ;;  %p169_p4 = scmp.lt.s32.totalorder %s16_s10, %s16_s10 }
   0xa   :  { %p165_p3 = scmp.ne.s32.totalorder %s16_s10, %s164_s18  ;;  %p170_p5 = scmp.lt.s32.totalorder %s164_s18, %s164_s18 }
   0xc   :  { %p171_p6 = por %p170_p5, %p169_p4 }
   0xe   :  { %p172_p7 = pnand %p171_p6, %p165_p3 }
  0x10   :  { %175 = shalt.err (!%p172_p7)
}
  0x11   :  { %s227_s19 = smov 128   ;;  %s228_s20 = smov 8  }
  0x12   :  { %21 = dma.hbm_to_vmem [thread:$0]  %s282_s0, 256, %s16_s10, [#allocation3], %s227_s19, %s227_s19, %s228_s20  }
  0x13   :  { %s229_s23 = smov [#allocation5]   ;;  %s176_s27 = scalar_lea.hbm %s283_s1, 256 }
  0x14   :  { %s27_s24 = sshll.u32 %s229_s23, 4  ;;  %p177_p8 = scmp.ne.s32.totalorder %s283_s1, %s176_s27  ;;  %s28_s24 = int_to_ptr.vmem [resolvable:$true] %s27_s24 }
  0x15   :  { %p180_p9 = scmp.lt.u32.totalorder %s176_s27, %s283_s1 }
  0x17   :  { %p182_p10 = pnand %p180_p9, %p177_p8 }
  0x19   :  { %185 = shalt.err (!%p182_p10)
}
  0x1a   :  { %s186_s4 = scalar_lea.vmem %s28_s24, 256  ;;  %p191_p12 = scmp.lt.s32.totalorder %s28_s24, %s28_s24 }
  0x1b   :  { %p187_p11 = scmp.ne.s32.totalorder %s28_s24, %s186_s4  ;;  %p192_p13 = scmp.lt.s32.totalorder %s186_s4, %s186_s4 }
  0x1d   :  { %p193_p0 = por %p192_p13, %p191_p12 }
  0x1f   :  { %p194_p1 = pnand %p193_p0, %p187_p11 }
  0x21   :  { %197 = shalt.err (!%p194_p1)
}
  0x22   :  { %33 = dma.hbm_to_vmem [thread:$0]  %s283_s1, 256, %s28_s24, [#allocation6], %s227_s19, %s227_s19, %s228_s20  }
  0x23   :  { %220 = dma.done.wait [#allocation3], 256  }
  0x24   :  { %221 = vsyncadd [#allocation3], 4294967040 }
  0x25   :  { %222 = dma.done.wait [#allocation6], 256  }
  0x26   :  { %223 = vsyncadd [#allocation6], 4294967040  ;;  %v40_v0 = vld [vmem:[#allocation2] sm:$0xff]  ;;  %v41_v1 = vld [vmem:[#allocation2 + $0x8] sm:$0xff]  ;;  %vm108_vm0 = vcmask 1040384   ;;  %vm110_vm1 = vcmask 1041408  }
  0x27   :  { %v131_v2 = vmul.f32 -1.442695, %v40_v0  ;;  %v132_v3 = vmul.f32 -1.442695, %v41_v1  ;;  %v42_v11 = vld [vmem:[#allocation5] sm:$0xff]  ;;  %v43_v12 = vld [vmem:[#allocation5 + $0x8] sm:$0xff] }
  0x28   :  { %v94_v18 = vadd.f32 %v43_v12, %v42_v11  ;;  %s230_s1 = smov [#allocation7]   ;;  %vm112_vm2 = vcmask 1042432  }
  0x29   :  { %138 = vpow2.f32 %v131_v2  ;;  %s121_s6 = sshll.u32 %s230_s1, 4  ;;  %s122_s6 = int_to_ptr.vmem [resolvable:$true] %s121_s6 }
  0x2a   :  { %140 = vpow2.f32 %v132_v3  ;;  %v95_v29 = vrot.slane %v94_v18, 4  ;;  %s198_s7 = scalar_lea.vmem %s122_s6, 64  ;;  %p203_p3 = scmp.lt.s32.totalorder %s122_s6, %s122_s6 }
  0x2b   :  { %p199_p2 = scmp.ne.s32.totalorder %s122_s6, %s198_s7  ;;  %p204_p4 = scmp.lt.s32.totalorder %s198_s7, %s198_s7 }
  0x2c   :  { %v96_v37 = vadd.f32 %v95_v29, %v94_v18 }
  0x2d   :  { %p205_p5 = por %p204_p4, %p203_p3 }
  0x2e   :  { %v97_v44 = vrot.slane %v96_v37, 2 }
  0x2f   :  { %p206_p6 = pnand %p205_p5, %p199_p2 }
  0x30   :  { %v98_v50 = vadd.f32 %v97_v44, %v96_v37 }
  0x32   :  { %v99_v55 = vrot.slane %v98_v50, 1 }
  0x33   :  { %v139_v4 = vpop.eup %138 }
  0x34   :  { %v141_v5 = vpop.eup %140  ;;  %v50_v6 = vadd.f32 1.0, %v139_v4  ;;  %v100_v60 = vadd.f32 %v99_v55, %v98_v50 }
  0x35   :  { %v51_v7 = vadd.f32 1.0, %v141_v5 }
  0x36   :  { %142 = vrcp.f32 %v50_v6 }
  0x37   :  { %144 = vrcp.f32 %v51_v7 }
  0x40   :  { %v143_v8 = vpop.eup %142 }
  0x41   :  { %v145_v9 = vpop.eup %144  ;;  %146 = vlog2.f32 %v143_v8  ;;  %v62_v10 = vsub.f32 1.0, %v143_v8  ;;  %v78_v14 = vmul.f32 %v143_v8, %v42_v11 }
  0x42   :  { %148 = vlog2.f32 %v145_v9  ;;  %v63_v13 = vsub.f32 1.0, %v145_v9  ;;  %v79_v15 = vmul.f32 %v145_v9, %v43_v12  ;;  %v87_v17 = vadd.f32 %v145_v9, %v143_v8 }
  0x43   :  { %150 = vlog2.f32 %v62_v10 }
  0x44   :  { %152 = vlog2.f32 %v63_v13  ;;  %v80_v16 = vadd.f32 %v79_v15, %v78_v14  ;;  %v88_v21 = vrot.slane %v87_v17, 4 }
  0x46   :  { %v81_v20 = vrot.slane %v80_v16, 4  ;;  %v89_v33 = vadd.f32 %v88_v21, %v87_v17 }
  0x48   :  { %v82_v32 = vadd.f32 %v81_v20, %v80_v16  ;;  %v90_v40 = vrot.slane %v89_v33, 2 }
  0x4a   :  { %v83_v39 = vrot.slane %v82_v32, 2  ;;  %v91_v47 = vadd.f32 %v90_v40, %v89_v33 }
  0x4b   :  { %v147_v19 = vpop.eup %146 }
  0x4c   :  { %v149_v22 = vpop.eup %148  ;;  %v57_v23 = vmul.f32 0.6931472, %v147_v19  ;;  %v84_v46 = vadd.f32 %v83_v39, %v82_v32  ;;  %v92_v52 = vrot.slane %v91_v47, 1 }
  0x4d   :  { %v151_v24 = vpop.eup %150  ;;  %v59_v25 = vmul.f32 0.6931472, %v149_v22 }
  0x4e   :  { %v153_v26 = vpop.eup %152  ;;  %v60_v27 = vmax.f32 %v57_v23, -100.0  ;;  %v65_v28 = vmul.f32 0.6931472, %v151_v24  ;;  %v85_v51 = vrot.slane %v84_v46, 1  ;;  %v93_v57 = vadd.f32 %v92_v52, %v91_v47 }
  0x4f   :  { %v61_v30 = vmax.f32 %v59_v25, -100.0  ;;  %v67_v31 = vmul.f32 0.6931472, %v153_v26 }
  0x50   :  { %v68_v34 = vmax.f32 %v65_v28, -100.0  ;;  %v86_v56 = vadd.f32 %v85_v51, %v84_v46 }
  0x51   :  { %v69_v35 = vmax.f32 %v67_v31, -100.0 }
  0x52   :  { %v70_v36 = vsub.f32 %v60_v27, %v68_v34  ;;  %v109_v62 = vsel %vm108_vm0, %v86_v56, %v93_v57 }
  0x53   :  { %v71_v38 = vsub.f32 %v61_v30, %v69_v35  ;;  %v111_v0 = vsel %vm110_vm1, %v109_v62, %v100_v60 }
  0x54   :  { %v72_v41 = vmul.f32 %v70_v36, %v42_v11 }
  0x55   :  { %v73_v42 = vmul.f32 %v71_v38, %v43_v12 }
  0x56   :  { %v74_v43 = vadd.f32 %v72_v41, %v68_v34 }
  0x57   :  { %v75_v45 = vadd.f32 %v73_v42, %v69_v35 }
  0x58   :  { %v76_v48 = vsub.f32 0.0, %v74_v43 }
  0x59   :  { %v77_v49 = vsub.f32 0.0, %v75_v45 }
  0x5b   :  { %v101_v53 = vadd.f32 %v77_v49, %v76_v48 }
  0x5d   :  { %v102_v54 = vrot.slane %v101_v53, 4 }
  0x5f   :  { %v103_v58 = vadd.f32 %v102_v54, %v101_v53 }
  0x61   :  { %v104_v59 = vrot.slane %v103_v58, 2 }
  0x63   :  { %v105_v61 = vadd.f32 %v104_v59, %v103_v58 }
  0x65   :  { %v106_v63 = vrot.slane %v105_v61, 1 }
  0x67   :  { %v107_v1 = vadd.f32 %v106_v63, %v105_v61 }
  0x69   :  { %v113_v2 = vsel %vm112_vm2, %v111_v0, %v107_v1 }
  0x6a   :  { %114 = vst [vmem:[#allocation7] sm:$0xf] %v113_v2 }
  0x6b   :  { %209 = shalt.err (!%p206_p6)
}
  0x6c   :  { %s210_s10 = scalar_lea.hbm %s284_s2, 64 }
  0x6d   :  { %p211_p7 = scmp.ne.s32.totalorder %s284_s2, %s210_s10  ;;  %p214_p8 = scmp.lt.u32.totalorder %s210_s10, %s284_s2 }
  0x6f   :  { %p216_p9 = pnand %p214_p8, %p211_p7 }
  0x71   :  { %219 = shalt.err (!%p216_p9)
}
  0x72   :  { %124 = dma.vmem_to_hbm [thread:$0]  %s122_s6, 64, %s284_s2, [#allocation4]  }
  0x73   :  { %224 = dma.done.wait [#allocation4], 64  }
  0x74   :  { %225 = vsyncadd [#allocation4], 4294967232 }
  0x75   :  { %128 = vsyncpa [#allocation3], 1 }
  0x76   :  { %129 = vsyncpa [#allocation6], 1 }
  0x77   :  { %130 = vsyncpa [#allocation4], 1 }

</bundles_post_ra>
